<compile_context>
chip_gen: v5e
topology: v5e:2x2
jax: 0.10.0
libtpu: 0.0.40
codegen_flags: <defaults>
</compile_context>

<pallas_src>
import functools

import jax
import jax.numpy as jnp
from jax import lax
from jax.experimental import pallas as pl
from jax.experimental.pallas import tpu as pltpu


def _ce_kernel(x_ref, t_ref, out_ref, *, tile_n, total_n, mask_rows):
    i = pl.program_id(0)

    x = x_ref[...]                        # (TN, C) native dtype (bf16 or f32)
    t = t_ref[...]                        # (TN, 1) int32 class ids
    c = x.shape[-1]

    # Row max in the native dtype (exact for max); only the per-row scalar is
    # upcast to f32.
    m = jnp.max(x, axis=-1, keepdims=True)                      # (TN, 1)
    m32 = m.astype(jnp.float32)

    # One-hot gather of the *raw* target logit.  A (1, C) iota broadcasts
    # against the (TN, 1) targets; compare/select/sum stay in native dtype
    # (exact for a one-hot select), then upcast the per-row scalar.
    cls = lax.broadcasted_iota(jnp.int32, (1, c), 1)            # (1, C)
    onehot = cls == t                                            # (TN, C)
    zero = jnp.zeros((), dtype=x.dtype)
    tgt32 = jnp.sum(jnp.where(onehot, x, zero),
                    axis=-1, keepdims=True).astype(jnp.float32)  # (TN, 1)

    # Numerically stable log-sum-exp; the f32 upcast lives inside the
    # streaming exp-sum chain (no stored full-tile f32 copy).
    s = jnp.sum(jnp.exp(x.astype(jnp.float32) - m32),
                axis=-1, keepdims=True)                          # (TN, 1)
    lse32 = jnp.log(s)

    # loss_i = log(sum(exp(x_i - m_i))) + m_i - x_i[target_i]
    loss = lse32 + m32 - tgt32                                   # (TN, 1)

    if mask_rows:
        is_last = i == pl.num_programs(0) - 1

        @pl.when(is_last)
        def _():
            # Mask rows past the true batch size (Pallas-padded / zero-padded
            # rows) immediately before the partial sum.
            row = i * tile_n + lax.broadcasted_iota(jnp.int32, (tile_n, 1), 0)
            masked = jnp.where(row < total_n, loss, 0.0)
            out_ref[...] = jnp.broadcast_to(jnp.sum(masked), out_ref.shape)

        @pl.when(jnp.logical_not(is_last))
        def _():
            out_ref[...] = jnp.broadcast_to(jnp.sum(loss), out_ref.shape)
    else:
        out_ref[...] = jnp.broadcast_to(jnp.sum(loss), out_ref.shape)


def _vmem_capacity_bytes():
    """Per-TensorCore VMEM capacity; conservative fallback if unavailable."""
    try:
        cap = int(pltpu.get_tpu_info().vmem_capacity_bytes)
        if cap > 0:
            return cap
    except Exception:
        pass
    return 64 * 2**20  # safe everywhere (v7x per-TC VMEM)


def cross_entropy_loss(inputs, targets, *, tile_n=None, logits_block_bytes=None):
    """inputs: (N, C) float logits (f32 or bf16), targets: (N,) int class ids.

    Returns the scalar mean cross-entropy loss as float32.
    """
    n, c = inputs.shape
    targets2d = targets.astype(jnp.int32).reshape(n, 1)

    # tiny-batch fallback: pad rows up to the 8-sublane minimum (masked away)
    if n < 8:
        pad = 8 - n
        inputs = jnp.pad(inputs, ((0, pad), (0, 0)))
        targets2d = jnp.pad(targets2d, ((0, pad), (0, 0)))

    n_rows = inputs.shape[0]
    itemsize = jnp.dtype(inputs.dtype).itemsize

    vmem_cap = _vmem_capacity_bytes()
    big_vmem = vmem_cap >= 96 * 2**20          # v5e / v6e: 128 MiB per TC
    if logits_block_bytes is None:
        # v7x (64 MiB VMEM): ~4 MiB logits blocks; v5e/v6e: ~8 MiB blocks.
        logits_block_bytes = (8 if big_vmem else 4) * 2**20
    vmem_ceiling = (100 if big_vmem else 52) * 2**20

    if tile_n is None:
        tile_n = logits_block_bytes // max(1, c * itemsize)
        tile_n = max(8, min(1024, (tile_n // 8) * 8))

    # Keep >=2 (ideally >=4) grid tiles so both v7x TensorCores get work and
    # each one stays double-buffered.
    if n_rows >= 4 * 8:
        tile_n = min(tile_n, max(8, ((n_rows // 4) // 8) * 8))
    elif n_rows >= 2 * 8:
        tile_n = min(tile_n, max(8, ((n_rows // 2) // 8) * 8))

    # never larger than the (8-aligned) number of rows actually present
    tile_n = max(8, min((tile_n // 8) * 8, (n_rows // 8) * 8))

    num_tiles = pl.cdiv(n_rows, tile_n)
    mask_rows = (n_rows % tile_n != 0) or (n_rows != n)

    # VMEM budget: double-buffered logits + lane-padded targets + output
    # blocks, plus headroom for the streaming f32 elementwise intermediates.
    logits_buf = tile_n * c * itemsize
    target_buf = tile_n * 128 * 4              # (tile_n, 1) int32 lane-padded
    out_buf = 8 * 128 * 4
    needed = 2 * (logits_buf + target_buf + out_buf)
    needed += 2 * tile_n * c * 4               # f32 intermediates (exp-sum)
    needed += 2 * 2**20                        # misc compiler scratch headroom
    vmem_limit = int(min(max(needed, 32 * 2**20), vmem_ceiling))

    kernel = functools.partial(_ce_kernel, tile_n=tile_n, total_n=n,
                               mask_rows=mask_rows)

    partials = pl.pallas_call(
        kernel,
        out_shape=jax.ShapeDtypeStruct((num_tiles, 8, 128), jnp.float32),
        grid_spec=pltpu.PrefetchScalarGridSpec(
            num_scalar_prefetch=0,
            grid=(num_tiles,),
            in_specs=[
                pl.BlockSpec((tile_n, c), lambda i: (i, 0)),   # logits tile
                pl.BlockSpec((tile_n, 1), lambda i: (i, 0)),   # target ids
            ],
            out_specs=pl.BlockSpec((1, 8, 128), lambda i: (i, 0, 0)),
        ),
        compiler_params=pltpu.CompilerParams(
            dimension_semantics=("parallel",),   # independent tiles (megacore)
            vmem_limit_bytes=vmem_limit,
        ),
    )(inputs, targets2d)

    # final (tiny) reduction + mean in plain JAX
    return jnp.sum(partials[:, 0, 0]) / jnp.float32(n)


def _reference(inputs, targets):
    x = inputs.astype(jnp.float32)
    x = x - jnp.max(x, axis=1, keepdims=True)
    lse = jnp.log(jnp.sum(jnp.exp(x), axis=-1))
    tgt = x[jnp.arange(x.shape[0]), targets]
    return jnp.mean(lse - tgt)


if __name__ == "__main__":
    key = jax.random.PRNGKey(0)

    # Case 1: small, evenly tiled f32 batch (2 tiles, no mask path)
    k1, k2, key = (*jax.random.split(key, 2), key)
    N, C = 16, 32
    x1 = jax.random.normal(k1, (N, C), dtype=jnp.float32)
    t1 = jax.random.randint(k2, (N,), 0, C, dtype=jnp.int32)
    loss1 = jax.block_until_ready(cross_entropy_loss(x1, t1))
    ref1 = _reference(x1, t1)
    assert jnp.allclose(loss1, ref1, atol=1e-5, rtol=1e-5), (loss1, ref1)

    # Case 2: batch not divisible by the tile size (last-tile mask path)
    k3, k4, key = (*jax.random.split(key, 2), key)
    N2, C2 = 19, 48
    x2 = jax.random.normal(k3, (N2, C2), dtype=jnp.float32)
    t2 = jax.random.randint(k4, (N2,), 0, C2, dtype=jnp.int32)
    loss2 = jax.block_until_ready(cross_entropy_loss(x2, t2))
    ref2 = _reference(x2, t2)
    assert jnp.allclose(loss2, ref2, atol=1e-5, rtol=1e-5), (loss2, ref2)

    # Case 3: bf16 logits ingested directly (halves HBM traffic), f32 lse math
    k5, k6, key = (*jax.random.split(key, 2), key)
    N3, C3 = 40, 256
    x3 = jax.random.normal(k5, (N3, C3), dtype=jnp.float32).astype(jnp.bfloat16)
    t3 = jax.random.randint(k6, (N3,), 0, C3, dtype=jnp.int32)
    loss3 = jax.block_until_ready(cross_entropy_loss(x3, t3))
    ref3 = _reference(x3, t3)
    assert jnp.allclose(loss3, ref3, atol=1e-4, rtol=1e-4), (loss3, ref3)

    # Case 4: tiny batch (< 8 rows) exercising the zero-pad + mask path
    k7, k8, _ = (*jax.random.split(key, 2), key)
    N4, C4 = 5, 64
    x4 = jax.random.normal(k7, (N4, C4), dtype=jnp.float32)
    t4 = jax.random.randint(k8, (N4,), 0, C4, dtype=jnp.int32)
    loss4 = jax.block_until_ready(cross_entropy_loss(x4, t4))
    ref4 = _reference(x4, t4)
    assert jnp.allclose(loss4, ref4, atol=1e-5, rtol=1e-5), (loss4, ref4)

    print("KERNEL_OK")
</pallas_src>

<mosaic_0001>
module attributes {stable_mosaic.version = 11 : i64} {
  func.func @_ce_kernel(%arg0: i32, %arg1: memref<8x32xf32, #tpu.memory_space<vmem>>, %arg2: memref<8x1xi32, #tpu.memory_space<vmem>>, %arg3: memref<1x8x128xf32, #tpu.memory_space<vmem>>) attributes {dimension_semantics = [#tpu.dimension_semantics<parallel>], iteration_bounds = array<i64: 2>, scalar_prefetch = 0 : i64, scratch_operands = 0 : i64, tpu.core_type = #tpu.core_type<tc>, window_params = [{transform_indices = @transform_0, window_bounds = array<i64: 8, 32>}, {transform_indices = @transform_1, window_bounds = array<i64: 8, 1>}, {transform_indices = @transform_2, window_bounds = array<i64: 1, 8, 128>}]} {
    %c0 = arith.constant 0 : index
    %c0_0 = arith.constant 0 : index
    %0 = vector.load %arg1[%c0, %c0_0] : memref<8x32xf32, #tpu.memory_space<vmem>>, vector<8x32xf32>
    %c0_1 = arith.constant 0 : index
    %c0_2 = arith.constant 0 : index
    %1 = vector.load %arg2[%c0_1, %c0_2] : memref<8x1xi32, #tpu.memory_space<vmem>>, vector<8x1xi32>
    %cst = arith.constant dense<0xFF800000> : vector<8xf32>
    %2 = vector.multi_reduction <maximumf>, %0, %cst [1] : vector<8x32xf32> to vector<8xf32>
    %3 = vector.shape_cast %2 : vector<8xf32> to vector<8x1xf32>
    %4 = tpu.iota {dimensions = array<i32: 1>} : vector<1x32xi32>
    %5 = vector.broadcast %4 : vector<1x32xi32> to vector<8x32xi32>
    %6 = vector.broadcast %1 : vector<8x1xi32> to vector<8x32xi32>
    %7 = arith.cmpi eq, %5, %6 : vector<8x32xi32>
    %cst_3 = arith.constant 0.000000e+00 : f32
    %8 = vector.broadcast %cst_3 : f32 to vector<8x32xf32>
    %9 = arith.select %7, %0, %8 : vector<8x32xi1>, vector<8x32xf32>
    %cst_4 = arith.constant dense<0.000000e+00> : vector<8xf32>
    %10 = vector.multi_reduction <add>, %9, %cst_4 [1] : vector<8x32xf32> to vector<8xf32>
    %11 = vector.shape_cast %10 : vector<8xf32> to vector<8x1xf32>
    %12 = vector.broadcast %3 : vector<8x1xf32> to vector<8x32xf32>
    %13 = arith.subf %0, %12 : vector<8x32xf32>
    %14 = math.exp %13 : vector<8x32xf32>
    %cst_5 = arith.constant dense<0.000000e+00> : vector<8xf32>
    %15 = vector.multi_reduction <add>, %14, %cst_5 [1] : vector<8x32xf32> to vector<8xf32>
    %16 = vector.shape_cast %15 : vector<8xf32> to vector<8x1xf32>
    %17 = math.log %16 : vector<8x1xf32>
    %18 = arith.addf %17, %3 : vector<8x1xf32>
    %19 = arith.subf %18, %11 : vector<8x1xf32>
    %20 = vector.shape_cast %19 : vector<8x1xf32> to vector<1x8x1xf32>
    %cst_6 = arith.constant dense<0.000000e+00> : vector<1xf32>
    %21 = vector.multi_reduction <add>, %20, %cst_6 [1, 2] : vector<1x8x1xf32> to vector<1xf32>
    %22 = vector.shape_cast %21 : vector<1xf32> to vector<1x1x1xf32>
    %23 = vector.extract %22[0, 0, 0] : f32 from vector<1x1x1xf32>
    %24 = vector.broadcast %23 : f32 to vector<1x8x128xf32>
    %c0_7 = arith.constant 0 : index
    %c0_8 = arith.constant 0 : index
    %c0_9 = arith.constant 0 : index
    %25 = vector.load %arg3[%c0_7, %c0_8, %c0_9] : memref<1x8x128xf32, #tpu.memory_space<vmem>>, vector<1x8x128xf32>
    tpu.vector_store %arg3[%c0_7, %c0_8, %c0_9], %24 {strides = array<i32>} : memref<1x8x128xf32, #tpu.memory_space<vmem>>, vector<1x8x128xf32>,
    return
  }
  func.func @transform_0(%arg0: i32) -> (i32, i32) {
    %c0_i32 = arith.constant 0 : i32
    %c0_i32_0 = arith.constant 0 : i32
    return %arg0, %c0_i32 : i32, i32
  }
  func.func @transform_1(%arg0: i32) -> (i32, i32) {
    %c0_i32 = arith.constant 0 : i32
    %c0_i32_0 = arith.constant 0 : i32
    return %arg0, %c0_i32 : i32, i32
  }
  func.func @transform_2(%arg0: i32) -> (i32, i32, i32) {
    %c0_i32 = arith.constant 0 : i32
    %c0_i32_0 = arith.constant 0 : i32
    %c0_i32_1 = arith.constant 0 : i32
    return %arg0, %c0_i32, %c0_i32_0 : i32, i32, i32
  }
}

</mosaic_0001>

<bundles_post_ra>
// kernel: tpu_custom_call.1
= control target key start
LH: loop header
LB: loop body
LE: loop exit
PB: predicated region body
PF: predicated region fallthrough
CT: control target
= control target key end

     0   :  { %7 = vsyncpa [#allocation3], 0  ;;  %s511_s0 = inlined_call_operand.vmem [shape: f32[16,32], index: 0, kind: input, shape index: {}]   ;;  %s512_s1 = inlined_call_operand.vmem [shape: s32[16,1], index: 1, kind: input, shape index: {}]   ;;  %s513_s2 = inlined_call_operand.hbm [shape: f32[2,8,128], index: 2, kind: output, shape index: {}]  }
   0x1   :  { %9 = vsyncpa [#allocation3 + $0x1], 0  ;;  %s420_s9 = smov 0   ;;  %s422_s10 = smov 0  }
   0x2   :  { %s424_s11 = smov 0   ;;  %s426_s12 = smov 0  }
   0x3 LB: > { %s441_s13 = sadd.s32 4294967295, %s402_s12   ;;  %s282_s14 = sadd.s32 4294967294, %s402_s12   ;;  %s402_s12 = sphi %s426_s12, %s519_s12   ;;  %s398_s11 = sphi %s424_s11, %s518_s11   ;;  %s394_s10 = sphi %s422_s10, %s517_s10   ;;  %s390_s9 = sphi %s420_s9, %s516_s9  }
   0x4   : > { %s445_s15 = sadd.s32 1, %s402_s12   ;;  %s74_s16 = sadd.s32 1, %s398_s11 }
   0x5   : > { %s71_s17 = ssub.s32 %s402_s12, %s445_s15  ;;  %p84_p0 = scmp.ne.s32.totalorder %s398_s11, %s394_s10 }
   0x6   : > { %p72_p1 = scmp.eq.s32.totalorder %s71_s17, 0  ;;  %p85_p2 = scmp.eq.s32.totalorder %s441_s13, 1 }
   0x7   : > { %p90_p3 = scmp.ne.s32.totalorder %s394_s10, %s390_s9  ;;  %p91_p4 = scmp.eq.s32.totalorder %s282_s14, 1 }
   0x8   : > { %s456_s18 = scalar_select %p72_p1, %s398_s11, %s74_s16  }
   0x9   : > { %p458_p5 = por %p85_p2, %p84_p0  ;;  %p462_p6 = por %p91_p4, %p90_p3 }
   0xa   : > { %p285_p7 = scmp.ge.s32.totalorder %s402_s12, 1  ;;  %p123_p8 = scmp.lt.s32.totalorder %s402_s12, 3 }
   0xc   : > { %p124_p9 = pnand %p285_p7, %p123_p8 }
   0xd   : > { %p148_p10 = scmp.lt.s32.totalorder (!%p124_p9), %s441_s13, 1  ;;  %s145_s29 = sand.u32 (!%p124_p9), 1, %s394_s10  }
   0xe   : > { %127 = sbr.rel (%p124_p9) target bundleno = 465 (0x1d1), region = 28  ;;  %s286_s30 = sshll.u32 (!%p124_p9), %s145_s29, 3 }
   0xf   : > { %s290_s3 = sshll.u32 (!%p124_p9), %s441_s13, 3  ;;  %s147_s7 = scalar_lea.vmem (!%p124_p9), [#allocation2], %s286_s30 }
  0x10   : > { %s206_s6 = scalar_lea.hbm (!%p124_p9), %s513_s2, %s290_s3  ;;  %s208_s8 = sshll.u32 (!%p124_p9), %s147_s7, 4  ;;  %s209_s8 = int_to_ptr.vmem [resolvable:$true] %s208_s8 }
  0x11   : > { %s210_s14 = sshll.u32 (!%p124_p9), %s206_s6, 4  ;;  %s196_s17 = scalar_lea.sflag (!%p124_p9), [#allocation3], %s145_s29  ;;  %s211_s14 = int_to_ptr.hbm [resolvable:$true] %s210_s14 }
  0x12   : > { %s360_s24 = scalar_lea.hbm (!%p124_p9), %s513_s2, 16 }
  0x13   : > { %v404_v0 = vmov 0   ;;  %s149_s21 = scalar_select %p148_p10, %s441_s13, 1  ;;  %vm158_vm0 = vcmask 261120   ;;  %v162_v9 = vlaneseq  ;;  %vm182_vm2 = vcmask 7168  }
  0x14   : > { %335 = vset.pattern.permute.xlu0 %v404_v0 }
  0x15   : > { %s287_s22 = sshll.u32 %s149_s21, 3  ;;  %v163_v10 = vand.u32 127, %v162_v9  ;;  %s354_s21 = sshra.s32 %s211_s14, 4  ;;  %s355_s21 = int_to_ptr.hbm [resolvable:$true] %s354_s21 }
  0x16   : > { %s151_s25 = scalar_lea.vmem %s511_s0, %s287_s22  ;;  %s155_s28 = scalar_lea.vmem %s512_s1, %s287_s22 }
  0x17   : > { %v156_v1 = vld [vmem:[%s151_s25] sm:$0xff]  ;;  %s356_s22 = scalar_lea.hbm %s355_s21, 8  ;;  %p361_p0 = scmp.lt.s32.totalorder %s355_s21, %s513_s2 }
  0x18   : > { %v159_v2 = vsel %vm158_vm0, %v156_v1, -inf  ;;  %v157_v3 = vld [vmem:[%s155_s28] sm:$0xff]  ;;  %p357_p11 = scmp.ne.s32.totalorder %s355_s21, %s356_s22  ;;  %p362_p1 = scmp.lt.s32.totalorder %s360_s24, %s356_s22 }
  0x19   : > { %160 = vmax.xlane.f32.xlu0 %v159_v2 }
  0x1a   : > { %p358_p12 = pnand %p357_p11, %p458_p5  ;;  %p363_p2 = por %p362_p1, %p361_p0 }
  0x1c   : > { %p359_p13 = pneg %p358_p12 }
  0x1e   : > { %p364_p3 = pnand %p363_p2, %p359_p13 }
  0x2d   : > { %165 = vperm.xlu0 %335, %v157_v3  }
  0x8c   : > { %v161_v4 = vpop.xlane.xlu0 %160 }
  0x8d   : > { %v172_v5 = vsub.f32 %v156_v1, %v161_v4 }
  0x8f   : > { %v173_v6 = vmul.f32 1.442695, %v172_v5 }
  0x91   : > { %336 = vpow2.f32 %v173_v6 }
  0x97   : > { %v337_v7 = vpop.eup %336 }
  0x98   : > { %v175_v8 = vsel %vm158_vm0, %v337_v7, 0.0 }
  0x99   : > { %176 = vadd.xlane.f32.xlu1 %v175_v8 }
  0x9f   : > { %v166_v11 = vpop.permute.xlu0 %165 }
  0xa0   : > { %vm167_vm1 = vcmp.eq.s32.totalorder %v163_v10, %v166_v11 }
  0xa1   : > { %v168_v12 = vsel %vm167_vm1, %v156_v1, 0.0 }
  0xa2   : > { %v169_v13 = vsel %vm158_vm0, %v168_v12, 0.0 }
  0xa3   : > { %170 = vadd.xlane.f32.xlu1 %v169_v13 }
 0x10c   : > { %v177_v14 = vpop.xlane.xlu1 %176 }
 0x10d   : > { %338 = vlog2.f32 %v177_v14 }
 0x113   : > { %v339_v15 = vpop.eup %338 }
 0x114   : > { %v179_v16 = vmul.f32 0.6931472, %v339_v15 }
 0x116   : > { %v180_v17 = vadd.f32 %v179_v16, %v161_v4  ;;  %v171_v18 = vpop.xlane.xlu1 %170 }
 0x118   : > { %v181_v19 = vsub.f32 %v180_v17, %v171_v18 }
 0x11a   : > { %v183_v20 = vsel %vm182_vm2, %v181_v19, 0.0 }
 0x11b   : > { %184 = vadd.xlane.f32.xlu2 %v183_v20 }
 0x18e   : > { %v185_v21 = vpop.xlane.xlu2 %184 }
 0x18f   : > { %v186_v22 = vrot.slane %v185_v21, 4 }
 0x191   : > { %v187_v23 = vadd.f32 %v186_v22, %v185_v21 }
 0x193   : > { %v188_v24 = vrot.slane %v187_v23, 2 }
 0x195   : > { %v189_v25 = vadd.f32 %v188_v24, %v187_v23 }
 0x197   : > { %v190_v26 = vrot.slane %v189_v25, 1 }
 0x199   : > { %v191_v27 = vadd.f32 %v190_v26, %v189_v25 }
 0x19b   : > { %293 = vpush %v191_v27 }
 0x1cc   : > { %s294_s16 = spop %293 }
 0x1cd   : > { %v193_v28 = vstv %s294_s16 }
 0x1ce   : > { %194 = vst [vmem:[%s147_s7] sm:$0xff] %v193_v28 }
 0x1cf   : > { %367 = shalt.err (!%p364_p3)
}
 0x1d0   : > { %295 = dma.vmem_to_hbm [thread:$0]  (%p458_p5), %s209_s8, 128, %s211_s14, %s196_s17  }
 0x1d1 PF: > { %p301_p4 = scmp.ge.s32.totalorder %s402_s12, 2  ;;  %s222_s27 = sand.u32 1, %s390_s9  }
 0x1d2   : > { %s223_s28 = scalar_lea.sflag [#allocation3], %s222_s27 }
 0x1d3   : > { %p298_p7 = pnand %p301_p4, %p462_p6 }
 0x1d5   : > { %p299_p8 = pneg %p298_p7 }
 0x1d7   : > { %385 = dma.done.wait (%p299_p8), %s223_s28, 128  }
 0x1d8   : > { %387 = vsyncadd (%p299_p8), %s223_s28, 4294967168  ;;  %p12_p9 = scmp.ge.s32.totalorder %s445_s15, 4   ;;  %s516_s9 = smov %s394_s10 }
 0x1d9   : > { %s517_s10 = smov %s398_s11  ;;  %s518_s11 = smov %s456_s18 }
 0x1da   : > { %s519_s12 = smov %s445_s15  ;;  %14 = sbr.rel (!%p12_p9) target bundleno = 3 (0x3), region = 66 }
 0x1df   :  { %229 = vsyncpa [#allocation3], 1 }
 0x1e0   :  { %231 = vsyncpa [#allocation3 + $0x1], 1 }

</bundles_post_ra>
